<compile_context>
chip_gen: v7x
topology: tpu7x:2x2x1
jax: 0.10.0
libtpu: 0.0.40
codegen_flags: <defaults>
</compile_context>

<pallas_src>
import math
import functools

import jax
import jax.numpy as jnp
from jax.experimental import pallas as pl
from jax.experimental.pallas import tpu as pltpu


def _multihead_kernel(x_ref, wqkv_ref, wo_ref, bo_ref, o_ref, *, num_heads, scale):
    # x_ref    : (1, S, D)  activations for one batch element
    # wqkv_ref : (D, 3*D)   fused [Wq^T | Wk^T | Wv^T] projection (heads = column blocks)
    # wo_ref   : (D, D)     output-projection weight, pre-transposed for `cat @ Wo^T`
    # bo_ref   : (1, D)     output-projection bias
    # o_ref    : (1, S, D)  output
    x = x_ref[0]                                            # (S, D)
    s_len, d_model = x.shape
    df = d_model // num_heads

    # One big MXU matmul computes Q, K, V for all heads at once.
    qkv = jnp.dot(x, wqkv_ref[...], preferred_element_type=jnp.float32)   # (S, 3D)
    q_all = qkv[:, :d_model] * scale                        # scale folded into Q once
    k_all = qkv[:, d_model:2 * d_model]
    v_all = qkv[:, 2 * d_model:]

    head_outs = []
    for h in range(num_heads):                              # static unroll, H is small
        lo = h * df
        q = q_all[:, lo:lo + df]                            # (S, df) static slices
        k = k_all[:, lo:lo + df]
        v = v_all[:, lo:lo + df]

        # scores = q_scaled @ k^T ; contract on df directly (no transpose op).
        scores = jax.lax.dot_general(
            q, k, (((1,), (1,)), ((), ())),
            preferred_element_type=jnp.float32)             # (S, S)

        # Numerically stable softmax along the last axis.
        m = jnp.max(scores, axis=-1, keepdims=True)
        e = jnp.exp(scores - m)
        p = e / jnp.sum(e, axis=-1, keepdims=True)

        head_outs.append(jnp.dot(p, v, preferred_element_type=jnp.float32))  # (S, df)

    # "concat + lin_agg" as one full-depth matmul: heads are consecutive column blocks.
    cat = jnp.concatenate(head_outs, axis=-1)               # (S, D)
    out = jnp.dot(cat, wo_ref[...], preferred_element_type=jnp.float32)      # (S, D)
    out = out + bo_ref[...]                                 # single broadcast bias add

    o_ref[0] = out.astype(o_ref.dtype)


def multihead_forward(x, wq, wk, wv, w_agg, b_agg):
    """x: (B, S, D) f32; wq/wk/wv: (H, df, D) torch Linear layout (out, in);
    w_agg: (D, D) torch layout; b_agg: (D,). Returns (B, S, D)."""
    B, S, D = x.shape
    H, df, _ = wq.shape
    assert H * df == D

    # Layout plumbing in the wrapper (done once, not compute-hoisting):
    #   x @ W_h^T  for all heads  ->  x @ Wt  with Wt[d, h*df + j] = W[h, j, d].
    wq_t = jnp.transpose(wq, (2, 0, 1)).reshape(D, D)       # (D, D)
    wk_t = jnp.transpose(wk, (2, 0, 1)).reshape(D, D)       # (D, D)
    wv_t = jnp.transpose(wv, (2, 0, 1)).reshape(D, D)       # (D, D)
    w_qkv = jnp.concatenate([wq_t, wk_t, wv_t], axis=1)     # (D, 3D)
    # lin_agg: out = cat @ W_agg^T + b.
    wo_t = jnp.transpose(w_agg, (1, 0))                     # (D, D)
    b2 = b_agg.reshape(1, D)

    scale = 1.0 / math.sqrt(D)                              # divide by d_model ** 0.5
    kernel = functools.partial(_multihead_kernel, num_heads=H, scale=scale)

    return pl.pallas_call(
        kernel,
        out_shape=jax.ShapeDtypeStruct((B, S, D), x.dtype),
        grid_spec=pltpu.PrefetchScalarGridSpec(
            num_scalar_prefetch=0,
            grid=(B,),
            in_specs=[
                pl.BlockSpec((1, S, D), lambda b: (b, 0, 0)),     # x: one batch row
                pl.BlockSpec((D, 3 * D), lambda b: (0, 0)),       # fused QKV weights
                pl.BlockSpec((D, D), lambda b: (0, 0)),           # output projection
                pl.BlockSpec((1, D), lambda b: (0, 0)),           # bias
            ],
            out_specs=pl.BlockSpec((1, S, D), lambda b: (b, 0, 0)),
        ),
        compiler_params=pltpu.CompilerParams(
            dimension_semantics=("parallel",),   # batch axis shards across TensorCores
        ),
    )(x, w_qkv, wo_t, b2)


def _multihead_ref(x, wq, wk, wv, w_agg, b_agg, d_model):
    """Plain-JAX reference matching the PyTorch module exactly."""
    outs = []
    for h in range(wq.shape[0]):
        q = x @ wq[h].T
        k = x @ wk[h].T
        v = x @ wv[h].T
        s = jnp.einsum("bqd,bkd->bqk", q, k) / math.sqrt(d_model)
        p = jax.nn.softmax(s, axis=-1)
        outs.append(jnp.einsum("bqk,bkd->bqd", p, v))
    cat = jnp.concatenate(outs, axis=-1)
    return cat @ w_agg.T + b_agg


if __name__ == "__main__":
    # Small shapes consistent with the module.
    h = 4
    d_model = 32
    df = d_model // h
    batch = 2
    seq = 8

    key = jax.random.PRNGKey(0)
    kx, kq, kk, kv, kw, kb = jax.random.split(key, 6)

    # Deterministic parameters in PyTorch Linear layout (out_features, in_features).
    bound = 1.0 / math.sqrt(d_model)
    wq = jax.random.uniform(kq, (h, df, d_model), jnp.float32, -bound, bound)
    wk = jax.random.uniform(kk, (h, df, d_model), jnp.float32, -bound, bound)
    wv = jax.random.uniform(kv, (h, df, d_model), jnp.float32, -bound, bound)
    w_agg = jax.random.uniform(kw, (d_model, d_model), jnp.float32, -bound, bound)
    b_agg = jax.random.uniform(kb, (d_model,), jnp.float32, -bound, bound)

    x = jax.random.normal(kx, (batch, seq, d_model), dtype=jnp.float32)

    out = multihead_forward(x, wq, wk, wv, w_agg, b_agg)
    out = jax.block_until_ready(out)

    ref = _multihead_ref(x, wq, wk, wv, w_agg, b_agg, d_model)
    assert out.shape == (batch, seq, d_model)
    assert out.dtype == jnp.float32
    assert jnp.allclose(out, ref, atol=1e-4, rtol=1e-4), float(jnp.max(jnp.abs(out - ref)))

    print("KERNEL_OK")
</pallas_src>

<mosaic_0001>
module attributes {stable_mosaic.version = 11 : i64} {
  func.func @_multihead_kernel(%arg0: i32, %arg1: memref<1x8x32xf32, #tpu.memory_space<vmem>>, %arg2: memref<32x96xf32, #tpu.memory_space<vmem>>, %arg3: memref<32x32xf32, #tpu.memory_space<vmem>>, %arg4: memref<1x32xf32, #tpu.memory_space<vmem>>, %arg5: memref<1x8x32xf32, #tpu.memory_space<vmem>>) attributes {dimension_semantics = [#tpu.dimension_semantics<parallel>], iteration_bounds = array<i64: 2>, scalar_prefetch = 0 : i64, scratch_operands = 0 : i64, tpu.core_type = #tpu.core_type<tc>, window_params = [{transform_indices = @transform_0, window_bounds = array<i64: 1, 8, 32>}, {pipeline_mode = #tpu.pipeline_mode<synchronous>, transform_indices = @transform_1, window_bounds = array<i64: 32, 96>}, {pipeline_mode = #tpu.pipeline_mode<synchronous>, transform_indices = @transform_2, window_bounds = array<i64: 32, 32>}, {pipeline_mode = #tpu.pipeline_mode<synchronous>, transform_indices = @transform_3, window_bounds = array<i64: 1, 32>}, {transform_indices = @transform_4, window_bounds = array<i64: 1, 8, 32>}]} {
    %c0 = arith.constant 0 : index
    %c0_0 = arith.constant 0 : index
    %c0_1 = arith.constant 0 : index
    %0 = vector.load %arg1[%c0, %c0_0, %c0_1] : memref<1x8x32xf32, #tpu.memory_space<vmem>>, vector<1x8x32xf32>
    %1 = vector.shape_cast %0 : vector<1x8x32xf32> to vector<8x32xf32>
    %c0_2 = arith.constant 0 : index
    %c0_3 = arith.constant 0 : index
    %2 = vector.load %arg2[%c0_2, %c0_3] : memref<32x96xf32, #tpu.memory_space<vmem>>, vector<32x96xf32>
    %cst = arith.constant dense<0.000000e+00> : vector<8x96xf32>
    %3 = tpu.matmul %1, %2, %cst {dimension_numbers = #tpu.dot_dimension_numbers<[1], [0], [0], [1], [0, 0, 1, 1], [], []>} : vector<8x32xf32>, vector<32x96xf32>, vector<8x96xf32> -> vector<8x96xf32>
    %4 = vector.extract_strided_slice %3 {offsets = [0, 0], sizes = [8, 32], strides = [1, 1]} : vector<8x96xf32> to vector<8x32xf32>
    %cst_4 = arith.constant 0.176776692 : f32
    %5 = vector.broadcast %cst_4 : f32 to vector<8x32xf32>
    %6 = arith.mulf %4, %5 : vector<8x32xf32>
    %7 = vector.extract_strided_slice %3 {offsets = [0, 32], sizes = [8, 32], strides = [1, 1]} : vector<8x96xf32> to vector<8x32xf32>
    %8 = vector.extract_strided_slice %3 {offsets = [0, 64], sizes = [8, 32], strides = [1, 1]} : vector<8x96xf32> to vector<8x32xf32>
    %9 = vector.extract_strided_slice %6 {offsets = [0, 0], sizes = [8, 8], strides = [1, 1]} : vector<8x32xf32> to vector<8x8xf32>
    %10 = vector.extract_strided_slice %7 {offsets = [0, 0], sizes = [8, 8], strides = [1, 1]} : vector<8x32xf32> to vector<8x8xf32>
    %11 = vector.extract_strided_slice %8 {offsets = [0, 0], sizes = [8, 8], strides = [1, 1]} : vector<8x32xf32> to vector<8x8xf32>
    %cst_5 = arith.constant dense<0.000000e+00> : vector<8x8xf32>
    %12 = tpu.matmul %9, %10, %cst_5 {dimension_numbers = #tpu.dot_dimension_numbers<[1], [1], [0], [0], [0, 0, 1, 0], [], []>} : vector<8x8xf32>, vector<8x8xf32>, vector<8x8xf32> -> vector<8x8xf32>
    %cst_6 = arith.constant dense<0xFF800000> : vector<8xf32>
    %13 = vector.multi_reduction <maximumf>, %12, %cst_6 [1] : vector<8x8xf32> to vector<8xf32>
    %14 = vector.shape_cast %13 : vector<8xf32> to vector<8x1xf32>
    %15 = vector.broadcast %14 : vector<8x1xf32> to vector<8x8xf32>
    %16 = arith.subf %12, %15 : vector<8x8xf32>
    %17 = math.exp %16 : vector<8x8xf32>
    %cst_7 = arith.constant dense<0.000000e+00> : vector<8xf32>
    %18 = vector.multi_reduction <add>, %17, %cst_7 [1] : vector<8x8xf32> to vector<8xf32>
    %19 = vector.shape_cast %18 : vector<8xf32> to vector<8x1xf32>
    %20 = vector.broadcast %19 : vector<8x1xf32> to vector<8x8xf32>
    %21 = arith.divf %17, %20 : vector<8x8xf32>
    %cst_8 = arith.constant dense<0.000000e+00> : vector<8x8xf32>
    %22 = tpu.matmul %21, %11, %cst_8 {dimension_numbers = #tpu.dot_dimension_numbers<[1], [0], [0], [1], [0, 0, 1, 1], [], []>} : vector<8x8xf32>, vector<8x8xf32>, vector<8x8xf32> -> vector<8x8xf32>
    %23 = vector.extract_strided_slice %6 {offsets = [0, 8], sizes = [8, 8], strides = [1, 1]} : vector<8x32xf32> to vector<8x8xf32>
    %24 = vector.extract_strided_slice %7 {offsets = [0, 8], sizes = [8, 8], strides = [1, 1]} : vector<8x32xf32> to vector<8x8xf32>
    %25 = vector.extract_strided_slice %8 {offsets = [0, 8], sizes = [8, 8], strides = [1, 1]} : vector<8x32xf32> to vector<8x8xf32>
    %cst_9 = arith.constant dense<0.000000e+00> : vector<8x8xf32>
    %26 = tpu.matmul %23, %24, %cst_9 {dimension_numbers = #tpu.dot_dimension_numbers<[1], [1], [0], [0], [0, 0, 1, 0], [], []>} : vector<8x8xf32>, vector<8x8xf32>, vector<8x8xf32> -> vector<8x8xf32>
    %cst_10 = arith.constant dense<0xFF800000> : vector<8xf32>
    %27 = vector.multi_reduction <maximumf>, %26, %cst_10 [1] : vector<8x8xf32> to vector<8xf32>
    %28 = vector.shape_cast %27 : vector<8xf32> to vector<8x1xf32>
    %29 = vector.broadcast %28 : vector<8x1xf32> to vector<8x8xf32>
    %30 = arith.subf %26, %29 : vector<8x8xf32>
    %31 = math.exp %30 : vector<8x8xf32>
    %cst_11 = arith.constant dense<0.000000e+00> : vector<8xf32>
    %32 = vector.multi_reduction <add>, %31, %cst_11 [1] : vector<8x8xf32> to vector<8xf32>
    %33 = vector.shape_cast %32 : vector<8xf32> to vector<8x1xf32>
    %34 = vector.broadcast %33 : vector<8x1xf32> to vector<8x8xf32>
    %35 = arith.divf %31, %34 : vector<8x8xf32>
    %cst_12 = arith.constant dense<0.000000e+00> : vector<8x8xf32>
    %36 = tpu.matmul %35, %25, %cst_12 {dimension_numbers = #tpu.dot_dimension_numbers<[1], [0], [0], [1], [0, 0, 1, 1], [], []>} : vector<8x8xf32>, vector<8x8xf32>, vector<8x8xf32> -> vector<8x8xf32>
    %37 = vector.extract_strided_slice %6 {offsets = [0, 16], sizes = [8, 8], strides = [1, 1]} : vector<8x32xf32> to vector<8x8xf32>
    %38 = vector.extract_strided_slice %7 {offsets = [0, 16], sizes = [8, 8], strides = [1, 1]} : vector<8x32xf32> to vector<8x8xf32>
    %39 = vector.extract_strided_slice %8 {offsets = [0, 16], sizes = [8, 8], strides = [1, 1]} : vector<8x32xf32> to vector<8x8xf32>
    %cst_13 = arith.constant dense<0.000000e+00> : vector<8x8xf32>
    %40 = tpu.matmul %37, %38, %cst_13 {dimension_numbers = #tpu.dot_dimension_numbers<[1], [1], [0], [0], [0, 0, 1, 0], [], []>} : vector<8x8xf32>, vector<8x8xf32>, vector<8x8xf32> -> vector<8x8xf32>
    %cst_14 = arith.constant dense<0xFF800000> : vector<8xf32>
    %41 = vector.multi_reduction <maximumf>, %40, %cst_14 [1] : vector<8x8xf32> to vector<8xf32>
    %42 = vector.shape_cast %41 : vector<8xf32> to vector<8x1xf32>
    %43 = vector.broadcast %42 : vector<8x1xf32> to vector<8x8xf32>
    %44 = arith.subf %40, %43 : vector<8x8xf32>
    %45 = math.exp %44 : vector<8x8xf32>
    %cst_15 = arith.constant dense<0.000000e+00> : vector<8xf32>
    %46 = vector.multi_reduction <add>, %45, %cst_15 [1] : vector<8x8xf32> to vector<8xf32>
    %47 = vector.shape_cast %46 : vector<8xf32> to vector<8x1xf32>
    %48 = vector.broadcast %47 : vector<8x1xf32> to vector<8x8xf32>
    %49 = arith.divf %45, %48 : vector<8x8xf32>
    %cst_16 = arith.constant dense<0.000000e+00> : vector<8x8xf32>
    %50 = tpu.matmul %49, %39, %cst_16 {dimension_numbers = #tpu.dot_dimension_numbers<[1], [0], [0], [1], [0, 0, 1, 1], [], []>} : vector<8x8xf32>, vector<8x8xf32>, vector<8x8xf32> -> vector<8x8xf32>
    %51 = vector.extract_strided_slice %6 {offsets = [0, 24], sizes = [8, 8], strides = [1, 1]} : vector<8x32xf32> to vector<8x8xf32>
    %52 = vector.extract_strided_slice %7 {offsets = [0, 24], sizes = [8, 8], strides = [1, 1]} : vector<8x32xf32> to vector<8x8xf32>
    %53 = vector.extract_strided_slice %8 {offsets = [0, 24], sizes = [8, 8], strides = [1, 1]} : vector<8x32xf32> to vector<8x8xf32>
    %cst_17 = arith.constant dense<0.000000e+00> : vector<8x8xf32>
    %54 = tpu.matmul %51, %52, %cst_17 {dimension_numbers = #tpu.dot_dimension_numbers<[1], [1], [0], [0], [0, 0, 1, 0], [], []>} : vector<8x8xf32>, vector<8x8xf32>, vector<8x8xf32> -> vector<8x8xf32>
    %cst_18 = arith.constant dense<0xFF800000> : vector<8xf32>
    %55 = vector.multi_reduction <maximumf>, %54, %cst_18 [1] : vector<8x8xf32> to vector<8xf32>
    %56 = vector.shape_cast %55 : vector<8xf32> to vector<8x1xf32>
    %57 = vector.broadcast %56 : vector<8x1xf32> to vector<8x8xf32>
    %58 = arith.subf %54, %57 : vector<8x8xf32>
    %59 = math.exp %58 : vector<8x8xf32>
    %cst_19 = arith.constant dense<0.000000e+00> : vector<8xf32>
    %60 = vector.multi_reduction <add>, %59, %cst_19 [1] : vector<8x8xf32> to vector<8xf32>
    %61 = vector.shape_cast %60 : vector<8xf32> to vector<8x1xf32>
    %62 = vector.broadcast %61 : vector<8x1xf32> to vector<8x8xf32>
    %63 = arith.divf %59, %62 : vector<8x8xf32>
    %cst_20 = arith.constant dense<0.000000e+00> : vector<8x8xf32>
    %64 = tpu.matmul %63, %53, %cst_20 {dimension_numbers = #tpu.dot_dimension_numbers<[1], [0], [0], [1], [0, 0, 1, 1], [], []>} : vector<8x8xf32>, vector<8x8xf32>, vector<8x8xf32> -> vector<8x8xf32>
    %65 = tpu.concatenate %22, %36, %50, %64 in 1 : vector<8x8xf32>, vector<8x8xf32>, vector<8x8xf32>, vector<8x8xf32> -> vector<8x32xf32>
    %c0_21 = arith.constant 0 : index
    %c0_22 = arith.constant 0 : index
    %66 = vector.load %arg3[%c0_21, %c0_22] : memref<32x32xf32, #tpu.memory_space<vmem>>, vector<32x32xf32>
    %cst_23 = arith.constant dense<0.000000e+00> : vector<8x32xf32>
    %67 = tpu.matmul %65, %66, %cst_23 {dimension_numbers = #tpu.dot_dimension_numbers<[1], [0], [0], [1], [0, 0, 1, 1], [], []>} : vector<8x32xf32>, vector<32x32xf32>, vector<8x32xf32> -> vector<8x32xf32>
    %c0_24 = arith.constant 0 : index
    %c0_25 = arith.constant 0 : index
    %68 = vector.load %arg4[%c0_24, %c0_25] : memref<1x32xf32, #tpu.memory_space<vmem>>, vector<1x32xf32>
    %69 = vector.broadcast %68 : vector<1x32xf32> to vector<8x32xf32>
    %70 = arith.addf %67, %69 : vector<8x32xf32>
    %c0_26 = arith.constant 0 : index
    %c0_27 = arith.constant 0 : index
    %c0_28 = arith.constant 0 : index
    %71 = vector.load %arg5[%c0_26, %c0_27, %c0_28] : memref<1x8x32xf32, #tpu.memory_space<vmem>>, vector<1x8x32xf32>
    %72 = vector.shape_cast %71 : vector<1x8x32xf32> to vector<8x32xf32>
    %73 = vector.shape_cast %70 : vector<8x32xf32> to vector<1x8x32xf32>
    tpu.vector_store %arg5[%c0_26, %c0_27, %c0_28], %73 {strides = array<i32>} : memref<1x8x32xf32, #tpu.memory_space<vmem>>, vector<1x8x32xf32>,
    return
  }
  func.func @transform_0(%arg0: i32) -> (i32, i32, i32) {
    %c0_i32 = arith.constant 0 : i32
    %c0_i32_0 = arith.constant 0 : i32
    %c0_i32_1 = arith.constant 0 : i32
    return %arg0, %c0_i32, %c0_i32_0 : i32, i32, i32
  }
  func.func @transform_1(%arg0: i32) -> (i32, i32) {
    %c0_i32 = arith.constant 0 : i32
    %c0_i32_0 = arith.constant 0 : i32
    %c0_i32_1 = arith.constant 0 : i32
    return %c0_i32, %c0_i32_0 : i32, i32
  }
  func.func @transform_2(%arg0: i32) -> (i32, i32) {
    %c0_i32 = arith.constant 0 : i32
    %c0_i32_0 = arith.constant 0 : i32
    %c0_i32_1 = arith.constant 0 : i32
    return %c0_i32, %c0_i32_0 : i32, i32
  }
  func.func @transform_3(%arg0: i32) -> (i32, i32) {
    %c0_i32 = arith.constant 0 : i32
    %c0_i32_0 = arith.constant 0 : i32
    %c0_i32_1 = arith.constant 0 : i32
    return %c0_i32, %c0_i32_0 : i32, i32
  }
  func.func @transform_4(%arg0: i32) -> (i32, i32, i32) {
    %c0_i32 = arith.constant 0 : i32
    %c0_i32_0 = arith.constant 0 : i32
    %c0_i32_1 = arith.constant 0 : i32
    return %arg0, %c0_i32, %c0_i32_0 : i32, i32, i32
  }
}

</mosaic_0001>

<bundles_post_ra>
// kernel: tpu_custom_call.1
= control target key start
LH: loop header
LB: loop body
LE: loop exit
PB: predicated region body
PF: predicated region fallthrough
CT: control target
= control target key end

     0   :  { %9 = vsyncpa [#allocation3], 0  ;;  %s1933_s0 = inlined_call_operand.hbm [shape: f32[2,8,32], index: 0, kind: input, shape index: {}]   ;;  %s1934_s1 = inlined_call_operand.hbm [shape: f32[32,96], index: 1, kind: input, shape index: {}]   ;;  %s1935_s2 = inlined_call_operand.hbm [shape: f32[32,32], index: 2, kind: input, shape index: {}]   ;;  %s1936_s3 = inlined_call_operand.vmem [shape: f32[1,32], index: 3, kind: input, shape index: {}]   ;;  %s1937_s4 = inlined_call_operand.hbm [shape: f32[2,8,32], index: 4, kind: output, shape index: {}]  }
   0x1   :  { %11 = vsyncpa [#allocation3 + $0x1], 0 }
   0x2   :  { %12 = vsyncpa [#allocation6], 0 }
   0x3   :  { %13 = vsyncpa [#allocation4], 0 }
   0x4   :  { %15 = vsyncpa [#allocation4 + $0x1], 0  ;;  %s1627_s15 = smov 0   ;;  %s1629_s16 = smov 0  }
   0x5   :  { %s1631_s17 = smov 0   ;;  %s1633_s18 = smov 0  }
   0x6 LB: > { %s1648_s19 = sadd.s32 4294967295, %s1577_s18   ;;  %s1188_s20 = sadd.s32 4294967294, %s1577_s18   ;;  %s1577_s18 = sphi %s1633_s18, %s1957_s18   ;;  %s1573_s17 = sphi %s1631_s17, %s1956_s17   ;;  %s1569_s16 = sphi %s1629_s16, %s1955_s16   ;;  %s1565_s15 = sphi %s1627_s15, %s1954_s15  }
   0x7   : > { %p41_p0 = scmp.ne.s32.totalorder %s1569_s16, %s1565_s15  ;;  %p1938_p1 = scmp.eq.s32.totalorder %s1648_s19, 0 }
   0x8   : > { %p134_p3 = scmp.eq.s32.totalorder %s1188_s20, 1  ;;  %p1189_p5 = scmp.ge.s32.totalorder %s1577_s18, 1 }
   0x9   : > { %p1657_p4 = por %p1938_p1, %p41_p0  ;;  %p141_p7 = scmp.lt.s32.totalorder %s1577_s18, 3 }
   0xa   : > { %p1662_p6 = por %p134_p3, %p41_p0  ;;  %s1579_s24 = smov [#allocation5]  }
   0xb   : > { %s1941_s21 = scalar_select %p1657_p4, 1, 0 }
   0xc   : > { %s1942_s22 = scalar_select %p1662_p6, 1, 0 }
   0xd   : > { %p1667_p8 = pnand %p1189_p5, %p141_p7  ;;  %s153_s25 = sshll.u32 %s1579_s24, 4  ;;  %s1671_s25 = int_to_ptr.vmem [resolvable:$true] %s153_s25 }
   0xe   : > { %s1580_s27 = smov [#allocation7]   ;;  %s1421_s5 = scalar_lea.hbm %s1934_s1, 512 }
   0xf   : > { %p1331_p9 = pneg %p1667_p8  ;;  %s166_s28 = sshll.u32 %s1580_s27, 4  ;;  %s1682_s28 = int_to_ptr.vmem [resolvable:$true] %s166_s28 }
  0x10   : > { %p1422_p12 = scmp.ne.s32.totalorder %s1934_s1, %s1421_s5  ;;  %p1428_p5 = scmp.lt.u32.totalorder %s1421_s5, %s1934_s1 }
  0x11   : > { %p1678_p11 = pnand %p1331_p9, %p1938_p1 }
  0x13   : > { %p1423_p13 = pneg %p1678_p11 }
  0x15   : > { %p1424_p0 = pnand %p1423_p13, %p1422_p12 }
  0x17   : > { %p1425_p3 = pneg %p1424_p0 }
  0x19   : > { %p1430_p7 = pnand %p1428_p5, %p1425_p3 }
  0x1b   : > { %1433 = shalt.err (!%p1430_p7)
}
  0x1c   : > { %s1434_s10 = scalar_lea.vmem %s1671_s25, 512  ;;  %p1442_p2 = scmp.lt.s32.totalorder %s1671_s25, %s1671_s25 }
  0x1d   : > { %p1435_p9 = scmp.ne.s32.totalorder %s1671_s25, %s1434_s10  ;;  %p1443_p12 = scmp.lt.s32.totalorder %s1434_s10, %s1434_s10 }
  0x1f   : > { %p1437_p10 = pnand %p1435_p9, %p1423_p13  ;;  %p1444_p0 = por %p1443_p12, %p1442_p2 }
  0x21   : > { %p1438_p1 = pneg %p1437_p10 }
  0x23   : > { %p1445_p6 = pnand %p1444_p0, %p1438_p1 }
  0x25   : > { %1448 = shalt.err (!%p1445_p6)
}
  0x26   : > { %s1581_s11 = smov 128   ;;  %s1582_s12 = smov 8  }
  0x27   : > { %1334 = dma.hbm_to_vmem [thread:$0]  (!%p1678_p11), %s1934_s1, 512, %s1671_s25, [#allocation6], %s1581_s11, %s1581_s11, %s1582_s12  }
  0x28   : > { %s1449_s27 = scalar_lea.hbm %s1935_s2, 512 }
  0x29   : > { %p1450_p2 = scmp.ne.s32.totalorder %s1935_s2, %s1449_s27  ;;  %p1456_p10 = scmp.lt.u32.totalorder %s1449_s27, %s1935_s2 }
  0x2b   : > { %p1452_p1 = pnand %p1450_p2, %p1423_p13 }
  0x2d   : > { %p1453_p6 = pneg %p1452_p1 }
  0x2f   : > { %p1458_p3 = pnand %p1456_p10, %p1453_p6 }
  0x31   : > { %1461 = shalt.err (!%p1458_p3)
}
  0x32   : > { %s1462_s25 = scalar_lea.vmem %s1682_s28, 512  ;;  %p1470_p12 = scmp.lt.s32.totalorder %s1682_s28, %s1682_s28 }
  0x33   : > { %p1463_p5 = scmp.ne.s32.totalorder %s1682_s28, %s1462_s25  ;;  %p1471_p0 = scmp.lt.s32.totalorder %s1462_s25, %s1462_s25 }
  0x35   : > { %p1465_p7 = pnand %p1463_p5, %p1423_p13  ;;  %p1472_p2 = por %p1471_p0, %p1470_p12 }
  0x37   : > { %p1466_p9 = pneg %p1465_p7 }
  0x39   : > { %p1473_p1 = pnand %p1472_p2, %p1466_p9 }
  0x3b   : > { %1476 = shalt.err (!%p1473_p1)
}
  0x3c   : > { %1337 = dma.hbm_to_vmem [thread:$0]  (!%p1678_p11), %s1935_s2, 512, %s1682_s28, [#allocation6], %s1581_s11, %s1581_s11, %s1582_s12  }
  0x3d   : > { %s1737_s9 = sadd.s32 1, %s1577_s18   ;;  %s28_s26 = sadd.s32 1, %s1573_s17 }
  0x3e   : > { %s25_s10 = ssub.s32 %s1577_s18, %s1737_s9  ;;  %p35_p13 = scmp.ne.s32.totalorder %s1573_s17, %s1569_s16 }
  0x3f   : > { %p26_p6 = scmp.eq.s32.totalorder %s25_s10, 0  ;;  %p36_p10 = scmp.eq.s32.totalorder %s1577_s18, 0 }
  0x40   : > { %p1945_p3 = scmp.eq.s32.totalorder %s1648_s19, 1  ;;  %p1348_p7 = scmp.lt.s32.totalorder %s1577_s18, 2 }
  0x41   : > { %s1753_s14 = scalar_select %p26_p6, %s1573_s17, %s28_s26  }
  0x42   : > { %p1747_p5 = por %p1945_p3, %p35_p13  ;;  %p37_p9 = por %p36_p10, %p35_p13 }
  0x43   : > { %s183_s20 = sand.u32 1, %s1573_s17   ;;  %s1194_s28 = sshll.u32 %s1577_s18, 7 }
  0x44   : > { %s1946_s13 = scalar_select %p1747_p5, 1, 0 }
  0x45   : > { %s1193_s24 = sshll.u32 %s183_s20, 3  ;;  %s1760_s27 = scalar_lea.hbm %s1933_s0, %s1194_s28 }
  0x46   : > { %s187_s29 = scalar_lea.vmem [#allocation2], %s1193_s24  ;;  %p1764_p11 = pnand %p1348_p7, %p37_p9 }
  0x47   : > { %s194_s30 = sshll.u32 %s187_s29, 4  ;;  %s184_s6 = scalar_lea.sflag [#allocation3], %s183_s20  ;;  %s1762_s30 = int_to_ptr.vmem [resolvable:$true] %s194_s30 }
  0x48   : > { %s1477_s25 = scalar_lea.hbm %s1760_s27, 128  ;;  %p1479_p0 = pneg %p1764_p11 }
  0x49   : > { %p1478_p12 = scmp.ne.s32.totalorder %s1760_s27, %s1477_s25  ;;  %s1482_s26 = scalar_lea.hbm %s1933_s0, 256 }
  0x4a   : > { %p1483_p13 = scmp.lt.u32.totalorder %s1760_s27, %s1933_s0  ;;  %p1484_p6 = scmp.lt.u32.totalorder %s1482_s26, %s1477_s25 }
  0x4b   : > { %p1480_p2 = pnand %p1479_p0, %p1478_p12  ;;  %p1486_p3 = scmp.lt.u32.totalorder %s1477_s25, %s1760_s27 }
  0x4c   : > { %p1485_p10 = por %p1484_p6, %p1483_p13 }
  0x4d   : > { %p1481_p1 = pneg %p1480_p2 }
  0x4e   : > { %p1487_p7 = por %p1486_p3, %p1485_p10 }
  0x50   : > { %p1488_p9 = pnand %p1487_p7, %p1481_p1 }
  0x52   : > { %1491 = shalt.err (!%p1488_p9)
}
  0x53   : > { %s1492_s20 = scalar_lea.vmem %s1762_s30, 128  ;;  %s1583_s28 = smov [#allocation2]  }
  0x54   : > { %p1493_p12 = scmp.ne.s32.totalorder %s1762_s30, %s1492_s20  ;;  %s1497_s11 = sshll.u32 %s1583_s28, 4  ;;  %s1498_s11 = int_to_ptr.vmem [resolvable:$false] %s1497_s11 }
  0x55   : > { %s1499_s12 = scalar_lea.vmem %s1498_s11, 256  ;;  %p1500_p4 = scmp.lt.s32.totalorder %s1762_s30, %s1498_s11 }
  0x56   : > { %p1495_p2 = pnand %p1493_p12, %p1479_p0  ;;  %p1501_p13 = scmp.lt.s32.totalorder %s1499_s12, %s1492_s20 }
  0x58   : > { %p1496_p5 = pneg %p1495_p2  ;;  %p1502_p6 = por %p1501_p13, %p1500_p4 }
  0x5a   : > { %p1503_p10 = pnand %p1502_p6, %p1496_p5 }
  0x5c   : > { %1506 = shalt.err (!%p1503_p10)
}
  0x5d   : > { %1341 = dma.hbm_to_vmem [thread:$0]  (!%p1764_p11), %s1760_s27, 128, %s1762_s30, %s184_s6  }
  0x5e   : > { %203 = sbr.rel (%p1667_p8) target bundleno = 2105 (0x839), region = 36  ;;  %s1796_s29 = sand.u32 (!%p1667_p8), 1, %s1569_s16  }
  0x5f   : > { %s1196_s25 = sshll.u32 (!%p1667_p8), %s1796_s29, 3  ;;  %s206_s7 = scalar_lea.sflag (!%p1667_p8), [#allocation3], %s1796_s29 }
  0x60   : > { %s209_s8 = scalar_lea.vmem (!%p1667_p8), [#allocation2], %s1196_s25  ;;  %p1948_p4 = scmp.ne.s32.totalorder (!%p1667_p8), %s1941_s21, 0 }
  0x65   : > { %1552 = dma.done.wait (%p1948_p4), %s206_s7, 128  }
  0x66   : > { %1554 = vsyncadd (%p1948_p4), %s206_s7, 4294967168  ;;  %p1949_p5 = scmp.eq.s32.totalorder %s1648_s19, 0 }
  0x68   : > { %1556 = dma.done.wait (%p1949_p5), [#allocation6], 1024   ;;  %p1950_p8 = pmov %p1949_p5 }
  0x69   : > { %v1584_v0 = vmov 0.0|0.0   ;;  %vm1585_vm0 = vmmov 0   ;;  %v1586_v1 = vmov 0.0   ;;  %v243_v2 = vld [vmem:[#allocation5] sm:$0xff]  ;;  %v244_v3 = vld [vmem:[#allocation5 + $0x8] sm:$0xff]  ;;  %v245_v4 = vld [vmem:[#allocation5 + $0x10] sm:$0xff] }
  0x6a   : > { %1558 = vsyncadd (%p1950_p8), [#allocation6], 4294966272  ;;  %1307 = vmatprep.subr.bf16.mxu0 %v1584_v0  ;;  %1253 = vmatprep.mubr.msk.f32.mxu0 %vm1585_vm0, %v1586_v1  ;;  %v1308_v5 = vpack.c.bf16 %v244_v3, %v243_v2  ;;  %v246_v6 = vld [vmem:[#allocation5 + $0x18] sm:$0xff]  ;;  %vm247_vm1 = vcmask 261120   ;;  %s1587_s21 = smov 64   ;;  %s1588_s23 = smov 96  }
  0x6b   : > { %1256 = vmatprep.subr.mxu1 %v1586_v1  ;;  %1258 = vmatprep.mubr.msk.f32.mxu1 %vm1585_vm0, %v1586_v1  ;;  %v1311_v7 = vpack.c.bf16 %v246_v6, %v245_v4  ;;  %v242_v8 = vld [vmem:[%s209_s8] sm:$0xff]  ;;  %s1589_s27 = smov 88   ;;  %s1590_s30 = smov 120   ;;  %vm325_vm2 = vcmask 64512   ;;  %vm996_vm3 = vcmask 130048   ;;  %vm998_vm4 = vcmask 195584  }
  0x6c   : > { %1309 = vmatpush3.bf16.msra.mxu0 %v1308_v5  ;;  %s1591_s5 = smov 80   ;;  %s1592_s6 = smov 72  }
  0x6d   : > { %1310 = vmatprep.subr.bf16.mxu0 %v1584_v0  ;;  %s1593_s26 = smov 112   ;;  %s1594_s10 = smov 104  }
  0x6e   : > { %s1595_s24 = smov 56   ;;  %s1596_s20 = smov 48  }
  0x6f   : > { %s1597_s28 = smov 40   ;;  %s1598_s11 = smov 8  }
  0x70   : > { %1312 = vmatpush3.bf16.msra.mxu0 %v1311_v7  ;;  %v1000_v7 = vld [vmem:[#allocation7] sm:$0xff]  ;;  %s1599_s12 = smov 16   ;;  %s1600_s7 = smov 24  }
  0x71   : > { %1276 = vmatprep.subr.mxu0 %v1586_v1  ;;  %p1951_p0 = scmp.ne.s32.totalorder %s1946_s13, 0 }
  0x73   : > { %1254 = vmatmul.mubr.msk.f32.vlgmr.msra.gmra.mrb[0].mxu0 %vm247_vm1, %v242_v8  ;;  %v1001_v8 = vld [vmem:[#allocation7 + $0x8] sm:$0xff] }
  0x74   : > { %1278 = vmatprep.mubr.msk.f32.mxu0 %vm1585_vm0, %v1586_v1 }
 0x146   : > { %v1821_v9 = vpop.f32.mrb[0].mxu0 }
 0x147   : > { %412 = vrot.lane.b32.xlu1 %v1821_v9, %s1587_s21  ;;  %323 = vrot.lane.b32.xlu0 %v1821_v9, %s1588_s23  ;;  %v1255_v10 = vpop.f32.mrb[1].mxu0  ;;  %v321_v11 = vmul.f32 0.17677669, %v1821_v9  ;;  %s1216_s23 = sshll.u32 %s1648_s19, 7 }
 0x148   : > { %v1002_v10 = vld [vmem:[#allocation7 + $0x10] sm:$0xff] }
 0x14b   : > { %490 = vrot.lane.b32.xlu1 %v1821_v9, %s1589_s27  ;;  %s241_s27 = scalar_lea.vmem [#allocation8], %s1196_s25  ;;  %s1601_s25 = smov [#allocation8]  }
 0x14f   : > { %488 = vrot.lane.b32.xlu1 %v321_v11, %s1590_s30  ;;  %s1099_s30 = sshll.u32 %s241_s27, 4  ;;  %s1890_s30 = int_to_ptr.vmem [resolvable:$true] %s1099_s30 }
 0x150   : > { %s1507_s19 = scalar_lea.vmem %s1890_s30, 128 }
 0x151   : > { %p1508_p11 = scmp.ne.s32.totalorder %s1890_s30, %s1507_s19 }
 0x153   : > { %655 = vrot.lane.b32.xlu1 %v1821_v9, %s1591_s5  ;;  %p1509_p1 = pnand %p1508_p11, %p1951_p0 }
 0x155   : > { %p1510_p3 = pneg %p1509_p1 }
 0x1b9   : > { %v413_v12 = vpop.permute.xlu1 %412  ;;  %v324_v13 = vpop.permute.xlu0 %323 }
 0x1ba   : > { %1257 = vmatpush3.xpose.msk.msra.mxu1 %vm325_vm2, %v324_v13 }
 0x1bb   : > { %1261 = vmatprep.subr.mxu1 %v1586_v1 }
 0x1bd   : > { %v491_v14 = vpop.permute.xlu1 %490  ;;  %1259 = vmatmul.mubr.msk.f32.vlgmr.msra.gmra.mrb[0].mxu1 %vm325_vm2, %v321_v11 }
 0x1be   : > { %1262 = vmatpush3.msra.mxu1 %v413_v12  ;;  %1263 = vmatprep.mubr.msk.f32.mxu1 %vm1585_vm0, %v1586_v1 }
 0x1bf   : > { %1266 = vmatprep.subr.mxu1 %v1586_v1 }
 0x1c1   : > { %v489_v15 = vpop.permute.xlu1 %488 }
 0x1c5   : > { %v656_v16 = vpop.permute.xlu1 %655 }
 0x1c6   : > { %1277 = vmatpush3.xpose.msk.msra.mxu0 %vm325_vm2, %v656_v16 }
 0x1c7   : > { %1286 = vmatprep.subr.mxu0 %v1586_v1 }
 0x290   : > { %v397_v17 = vpop.f32.mrb[0].mxu1 }
 0x291   : > { %v1260_v18 = vpop.f32.mrb[1].mxu1  ;;  %v401_v19 = vsel %vm325_vm2, %v397_v17, -inf }
 0x292   : > { %402 = vmax.xlane.f32.xlu0 %v401_v19 }
 0x2a8   : > { %820 = vrot.lane.b32.xlu0 %v1821_v9, %s1592_s6 }
 0x31f   : > { %v403_v20 = vpop.xlane.xlu0 %402 }
 0x320   : > { %v404_v21 = vsub.f32 %v397_v17, %v403_v20 }
 0x322   : > { %v405_v22 = vmul.f32 1.442695, %v404_v21 }
 0x323   : > { %v821_v27 = vpop.permute.xlu0 %820 }
 0x324   : > { %1405 = vpow2.f32 %v405_v22 }
 0x32e   : > { %v1406_v23 = vpop.eup %1405 }
 0x32f   : > { %v407_v24 = vsel %vm325_vm2, %v1406_v23, 0.0 }
 0x330   : > { %408 = vadd.xlane.f32.xlu1 %v407_v24 }
 0x341   : > { %653 = vrot.lane.b32.xlu1 %v321_v11, %s1593_s26  ;;  %s1888_s26 = scalar_lea.hbm %s1937_s4, %s1216_s23 }
 0x345   : > { %818 = vrot.lane.b32.xlu1 %v321_v11, %s1594_s10  ;;  %v1003_v11 = vld [vmem:[#allocation7 + $0x18] sm:$0xff]  ;;  %s1086_s10 = scalar_lea.sflag [#allocation4], %s1796_s29 }
 0x346   : > { %v1317_v12 = vpack.c.bf16 %v1003_v11, %v1002_v10 }
 0x3bd   : > { %v409_v25 = vpop.xlane.xlu1 %408 }
 0x3be   : > { %1407 = vrcp.f32 %v409_v25 }
 0x3c1   : > { %v654_v26 = vpop.permute.xlu1 %653 }
 0x3c2   : > { %1279 = vmatmul.mubr.msk.f32.vlgmr.msra.gmra.mrb[2].mxu0 %vm325_vm2, %v654_v26 }
 0x3c3   : > { %1287 = vmatpush3.xpose.msk.msra.mxu0 %vm325_vm2, %v821_v27  ;;  %1288 = vmatprep.mubr.msk.f32.mxu0 %vm1585_vm0, %v1586_v1 }
 0x3c4   : > { %1313 = vmatprep.subr.bf16.mxu0 %v1584_v0 }
 0x3c5   : > { %v819_v28 = vpop.permute.xlu1 %818 }
 0x3c6   : > { %1289 = vmatmul.mubr.msk.f32.vlgmr.msra.gmra.mrb[4].mxu0 %vm325_vm2, %v819_v28 }
 0x3c7   : > { %1304 = vmatprep.mubr.msk.f32.mxu0 %vm1585_vm0, %v1586_v1 }
 0x3c8   : > { %v1408_v29 = vpop.eup %1407 }
 0x3c9   : > { %v411_v30 = vmul.f32 %v1408_v29, %v1406_v23  ;;  %v1213_v23 = vld [vmem:[%s1936_s3] ss:$0 sm:$0xff] }
 0x3cb   : > { %1264 = vmatmul.mubr.msk.f32.vlgmr.msra.gmra.mrb[2].mxu1 %vm325_vm2, %v411_v30 }
 0x3cc   : > { %1267 = vmatpush3.xpose.msk.msra.mxu1 %vm325_vm2, %v491_v14  ;;  %1268 = vmatprep.mubr.msk.f32.mxu1 %vm1585_vm0, %v1586_v1 }
 0x3cd   : > { %1271 = vmatprep.subr.mxu1 %v1586_v1 }
 0x3cf   : > { %1269 = vmatmul.mubr.msk.f32.vlgmr.msra.gmra.mrb[4].mxu1 %vm325_vm2, %v489_v15 }
 0x3d0   : > { %1273 = vmatprep.mubr.msk.f32.mxu1 %vm1585_vm0, %v1586_v1 }
 0x495   : > { %v727_v31 = vpop.f32.mrb[2].mxu0 }
 0x496   : > { %v1280_v32 = vpop.f32.mrb[3].mxu0  ;;  %v731_v33 = vsel %vm325_vm2, %v727_v31, -inf }
 0x497   : > { %732 = vmax.xlane.f32.xlu0 %v731_v33 }
 0x499   : > { %v892_v34 = vpop.f32.mrb[4].mxu0 }
 0x49a   : > { %v1290_v35 = vpop.f32.mrb[5].mxu0  ;;  %v896_v41 = vsel %vm325_vm2, %v892_v34, -inf }
 0x49e   : > { %v1856_v36 = vpop.f32.mrb[2].mxu1 }
 0x49f   : > { %v1265_v37 = vpop.f32.mrb[3].mxu1 }
 0x4a2   : > { %v562_v38 = vpop.f32.mrb[4].mxu1 }
 0x4a3   : > { %v1270_v39 = vpop.f32.mrb[5].mxu1  ;;  %v566_v40 = vsel %vm325_vm2, %v562_v38, -inf }
 0x4a4   : > { %567 = vmax.xlane.f32.xlu1 %v566_v40 }
 0x4a8   : > { %897 = vmax.xlane.f32.xlu1 %v896_v41 }
 0x524   : > { %v733_v42 = vpop.xlane.xlu0 %732 }
 0x525   : > { %v734_v43 = vsub.f32 %v727_v31, %v733_v42 }
 0x527   : > { %v735_v44 = vmul.f32 1.442695, %v734_v43 }
 0x529   : > { %1409 = vpow2.f32 %v735_v44 }
 0x531   : > { %v568_v45 = vpop.xlane.xlu1 %567 }
 0x532   : > { %v569_v53 = vsub.f32 %v562_v38, %v568_v45 }
 0x533   : > { %v1410_v46 = vpop.eup %1409 }
 0x534   : > { %v737_v47 = vsel %vm325_vm2, %v1410_v46, 0.0  ;;  %v570_v54 = vmul.f32 1.442695, %v569_v53 }
 0x535   : > { %738 = vadd.xlane.f32.xlu1 %v737_v47  ;;  %v898_v48 = vpop.xlane.xlu1 %897 }
 0x536   : > { %v899_v49 = vsub.f32 %v892_v34, %v898_v48 }
 0x538   : > { %v900_v50 = vmul.f32 1.442695, %v899_v49 }
 0x53a   : > { %1411 = vpow2.f32 %v900_v50 }
 0x53b   : > { %1413 = vpow2.f32 %v570_v54 }
 0x544   : > { %v1412_v51 = vpop.eup %1411 }
 0x545   : > { %v902_v52 = vsel %vm325_vm2, %v1412_v51, 0.0  ;;  %v1414_v55 = vpop.eup %1413 }
 0x546   : > { %577 = vrot.lane.b32.xlu1 %v1821_v9, %s1595_s24  ;;  %903 = vadd.xlane.f32.xlu0 %v902_v52  ;;  %v572_v56 = vsel %vm325_vm2, %v1414_v55, 0.0  ;;  %s1511_s24 = sshll.u32 %s1601_s25, 4  ;;  %s1512_s24 = int_to_ptr.vmem [resolvable:$false] %s1511_s24 }
 0x547   : > { %p1514_p7 = scmp.lt.s32.totalorder %s1890_s30, %s1512_s24 }
 0x55c   : > { %742 = vrot.lane.b32.xlu0 %v1821_v9, %s1596_s20  ;;  %s1513_s20 = scalar_lea.vmem %s1512_s24, 256 }
 0x55d   : > { %p1515_p9 = scmp.lt.s32.totalorder %s1513_s20, %s1507_s19 }
 0x55f   : > { %p1516_p12 = por %p1515_p9, %p1514_p7 }
 0x561   : > { %p1517_p2 = pnand %p1516_p12, %p1510_p3 }
 0x56a   : > { %573 = vadd.xlane.f32.xlu1 %v572_v56 }
 0x57b   : > { %907 = vrot.lane.b32.xlu1 %v1821_v9, %s1597_s28  ;;  %v1314_v9 = vpack.c.bf16 %v1001_v8, %v1000_v7 }
 0x57d   : > { %1315 = vmatpush3.bf16.msra.mxu0 %v1314_v9 }
 0x57e   : > { %1316 = vmatprep.subr.bf16.mxu0 %v1584_v0 }
 0x581   : > { %1318 = vmatpush3.bf16.msra.mxu0 %v1317_v12 }
 0x5c2   : > { %v739_v57 = vpop.xlane.xlu1 %738 }
 0x5c6   : > { %v578_v58 = vpop.permute.xlu1 %577 }
 0x5c7   : > { %1272 = vmatpush3.msra.mxu1 %v578_v58 }
 0x5c8   : > { %1281 = vmatprep.subr.mxu1 %v1586_v1 }
 0x5d3   : > { %v904_v60 = vpop.xlane.xlu0 %903 }
 0x5d7   : > { %v743_v2 = vpop.permute.xlu0 %742 }
 0x5f7   : > { %v574_v59 = vpop.xlane.xlu1 %573 }
 0x5f8   : > { %1415 = vrcp.f32 %v574_v59 }
 0x5f9   : > { %1417 = vrcp.f32 %v739_v57 }
 0x5fa   : > { %1419 = vrcp.f32 %v904_v60 }
 0x5fb   : > { %v908_v5 = vpop.permute.xlu1 %907 }
 0x602   : > { %v1416_v61 = vpop.eup %1415 }
 0x603   : > { %v576_v62 = vmul.f32 %v1416_v61, %v1414_v55  ;;  %v1418_v63 = vpop.eup %1417 }
 0x604   : > { %v741_v3 = vmul.f32 %v1418_v63, %v1410_v46  ;;  %v1420_v4 = vpop.eup %1419 }
 0x605   : > { %1274 = vmatmul.mubr.msk.f32.vlgmr.msra.gmra.mrb[6].mxu1 %vm325_vm2, %v576_v62  ;;  %v906_v6 = vmul.f32 %v1420_v4, %v1412_v51 }
 0x606   : > { %1282 = vmatpush3.msra.mxu1 %v743_v2  ;;  %1283 = vmatprep.mubr.msk.f32.mxu1 %vm1585_vm0, %v1586_v1 }
 0x607   : > { %1291 = vmatprep.subr.mxu1 %v1586_v1 }
 0x609   : > { %1284 = vmatmul.mubr.msk.f32.vlgmr.msra.gmra.mrb[8].mxu1 %vm325_vm2, %v741_v3 }
 0x60a   : > { %1292 = vmatpush3.msra.mxu1 %v908_v5  ;;  %1293 = vmatprep.mubr.msk.f32.mxu1 %vm1585_vm0, %v1586_v1 }
 0x60d   : > { %1294 = vmatmul.mubr.msk.f32.vlgmr.msra.gmra.mrb[10].mxu1 %vm325_vm2, %v906_v6 }
 0x6d8   : > { %v649_v13 = vpop.f32.mrb[6].mxu1 }
 0x6d9   : > { %984 = vrot.lane.b32.xlu1 %v649_v13, %s1598_s11  ;;  %v1275_v14 = vpop.f32.mrb[7].mxu1 }
 0x6dc   : > { %v814_v15 = vpop.f32.mrb[8].mxu1 }
 0x6dd   : > { %988 = vrot.lane.b32.xlu0 %v814_v15, %s1599_s12  ;;  %v1285_v1 = vpop.f32.mrb[9].mxu1 }
 0x6e0   : > { %v979_v16 = vpop.f32.mrb[10].mxu1 }
 0x6e1   : > { %992 = vrot.lane.b32.xlu1 %v979_v16, %s1600_s7  ;;  %v1295_v17 = vpop.f32.mrb[11].mxu1 }
 0x74b   : > { %v985_v18 = vpop.permute.xlu1 %984 }
 0x74c   : > { %v995_v19 = vsel %vm325_vm2, %v1856_v36, %v985_v18 }
 0x74f   : > { %v989_v0 = vpop.permute.xlu0 %988 }
 0x750   : > { %v997_v20 = vsel %vm996_vm3, %v995_v19, %v989_v0 }
 0x753   : > { %v993_v21 = vpop.permute.xlu1 %992 }
 0x754   : > { %v999_v22 = vsel %vm998_vm4, %v997_v20, %v993_v21 }
 0x755   : > { %1305 = vmatmul.mubr.msk.f32.vlgmr.msra.gmra.mrb[6].mxu0 %vm247_vm1, %v999_v22 }
 0x828   : > { %v1080_v24 = vpop.f32.mrb[6].mxu0 }
 0x829   : > { %v1081_v25 = vadd.f32 %v1213_v23, %v1080_v24  ;;  %v1306_v26 = vpop.f32.mrb[7].mxu0 }
 0x82b   : > { %1084 = vst.msk [vmem:[%s241_s27] sm:$0xff] %vm247_vm1, %v1081_v25 }
 0x82c   : > { %1520 = shalt.err (!%p1517_p2)
}
 0x82d   : > { %s1521_s29 = scalar_lea.hbm %s1888_s26, 128  ;;  %s1525_s12 = scalar_lea.hbm %s1937_s4, 256 }
 0x82e   : > { %p1522_p13 = scmp.ne.s32.totalorder %s1888_s26, %s1521_s29  ;;  %p1526_p4 = scmp.lt.u32.totalorder %s1888_s26, %s1937_s4 }
 0x82f   : > { %p1527_p5 = scmp.lt.u32.totalorder %s1525_s12, %s1521_s29  ;;  %p1529_p11 = scmp.lt.u32.totalorder %s1521_s29, %s1888_s26 }
 0x830   : > { %p1523_p6 = pnand %p1522_p13, %p1951_p0 }
 0x831   : > { %p1528_p8 = por %p1527_p5, %p1526_p4 }
 0x832   : > { %p1524_p10 = pneg %p1523_p6 }
 0x833   : > { %p1530_p1 = por %p1529_p11, %p1528_p8 }
 0x835   : > { %p1531_p3 = pnand %p1530_p1, %p1524_p10 }
 0x837   : > { %1534 = shalt.err (!%p1531_p3)
}
 0x838   : > { %1329 = dma.vmem_to_hbm [thread:$0]  (%p1951_p0), %s1890_s30, 128, %s1888_s26, %s1086_s10  }
 0x839 PF: > { %s1111_s21 = sand.u32 1, %s1565_s15   ;;  %p1952_p7 = scmp.ne.s32.totalorder %s1942_s22, 0 }
 0x83a   : > { %p1953_p9 = scmp.ge.s32.totalorder %s1577_s18, 2  ;;  %s1112_s23 = scalar_lea.sflag [#allocation4], %s1111_s21 }
 0x83c   : > { %p1343_p12 = pnand %p1953_p9, %p1952_p7 }
 0x83e   : > { %1560 = dma.done.wait (!%p1343_p12), %s1112_s23, 128  }
 0x83f   : > { %1562 = vsyncadd (!%p1343_p12), %s1112_s23, 4294967168  ;;  %p18_p2 = scmp.ge.s32.totalorder %s1737_s9, 4   ;;  %s1954_s15 = smov %s1569_s16 }
 0x840   : > { %s1955_s16 = smov %s1573_s17  ;;  %s1956_s17 = smov %s1753_s14 }
 0x841   : > { %s1957_s18 = smov %s1737_s9  ;;  %20 = sbr.rel (!%p18_p2) target bundleno = 6 (0x6), region = 89 }
 0x848   :  { %1117 = vsyncpa [#allocation3], 1 }
 0x849   :  { %1119 = vsyncpa [#allocation3 + $0x1], 1 }
 0x84a   :  { %1120 = vsyncpa [#allocation6], 1 }
 0x84b   :  { %1121 = vsyncpa [#allocation4], 1 }
 0x84c   :  { %1123 = vsyncpa [#allocation4 + $0x1], 1 }

</bundles_post_ra>
